<compile_context>
chip_gen: v7x
topology: tpu7x:2x2x1
jax: 0.10.0
libtpu: 0.0.40
codegen_flags: <defaults>
</compile_context>

<pallas_src>
import functools

import jax
import jax.numpy as jnp
import numpy as np
from jax.experimental import pallas as pl
from jax.experimental.pallas import tpu as pltpu


def _conv_bn_relu_kernel(x_ref, w_ref, shift_ref, o_ref):
    """Fused conv (single K=KT*Cin matmul) + BN shift + ReLU, lane-dense output.

    x_ref:     (NB, K, HW)   packed input taps (contraction axis K = KT*Cin)
    w_ref:     (Cout, K)     conv weights with BN scale pre-folded
    shift_ref: (Cout, 1)     beta - running_mean * scale   (f32)
    o_ref:     (NB, Cout, HW)
    """
    nb = x_ref.shape[0]
    w = w_ref[...]            # load once; reused across the (small) batch loop
    shift = shift_ref[...]    # (Cout, 1) -> lane-broadcast against (Cout, HW)
    for b in range(nb):       # small batch folded into one grid step
        acc = jnp.dot(w, x_ref[b], preferred_element_type=jnp.float32)  # (Cout, HW)
        o_ref[b] = jnp.maximum(acc + shift, 0.0).astype(o_ref.dtype)


def conv_bn_relu(x_nchw, weight_oihw, gamma, beta, running_mean, running_var,
                 *, stride=1, padding=1, eps=1e-5, compute_dtype=jnp.float32):
    """ConvBNReLU forward. x_nchw: (N, Cin, H, W); weight_oihw: (Cout, Cin, KH, KW).

    compute_dtype: dtype fed to the MXU (jnp.bfloat16 recommended on v6e/v7x);
    accumulation and the BN/ReLU epilogue stay in float32.
    """
    n, cin, h, w = x_nchw.shape
    cout, _, kh, kw = weight_oihw.shape
    h_out = (h + 2 * padding - kh) // stride + 1
    w_out = (w + 2 * padding - kw) // stride + 1
    hw = h_out * w_out
    kt = kh * kw
    k = kt * cin

    # ---- plain-JAX glue: BN folding + packed-im2col along the contraction axis ----
    inv_std = 1.0 / jnp.sqrt(running_var.astype(jnp.float32) + eps)
    scale = gamma.astype(jnp.float32) * inv_std                                # (Cout,)
    shift = beta.astype(jnp.float32) - running_mean.astype(jnp.float32) * scale

    # Fold BN scale into the conv weights: (Cout, Cin, KH, KW) -> (Cout, KT*Cin),
    # packed in (dy, dx, cin) order to match the activation packing below.
    w_folded = weight_oihw.astype(jnp.float32) * scale[:, None, None, None]
    w_folded = jnp.transpose(w_folded, (0, 2, 3, 1)).reshape(cout, k)

    # Stay in NCHW; pad spatial dims and pack the KT shifted views along the
    # contraction axis so the kernel reads the stacked array once per step.
    x_pad = jnp.pad(x_nchw.astype(jnp.float32),
                    ((0, 0), (0, 0), (padding, padding), (padding, padding)))
    taps = []
    for dy in range(kh):
        for dx in range(kw):
            view = x_pad[:, :, dy:dy + stride * h_out:stride,
                               dx:dx + stride * w_out:stride]
            taps.append(view.reshape(n, cin, hw))
    x_packed = jnp.stack(taps, axis=1).reshape(n, k, hw)        # (N, KT*Cin, HW)

    x_packed = x_packed.astype(compute_dtype)
    w_folded = w_folded.astype(compute_dtype)
    shift2d = shift.reshape(cout, 1)

    # ---- Pallas kernel: whole batch in one grid step (tiny shapes) ----
    out = pl.pallas_call(
        _conv_bn_relu_kernel,
        out_shape=jax.ShapeDtypeStruct((n, cout, hw), jnp.float32),
        grid=(1,),
        in_specs=[
            pl.BlockSpec((n, k, hw), lambda i: (0, 0, 0)),
            pl.BlockSpec((cout, k), lambda i: (0, 0)),
            pl.BlockSpec((cout, 1), lambda i: (0, 0)),
        ],
        out_specs=pl.BlockSpec((n, cout, hw), lambda i: (0, 0, 0)),
        compiler_params=pltpu.CompilerParams(dimension_semantics=("arbitrary",)),
    )(x_packed, w_folded, shift2d)

    # (N, Cout, HW) reshapes straight back to NCHW — no transpose needed.
    return out.reshape(n, cout, h_out, w_out)


def _reference(x_nchw, weight_oihw, gamma, beta, running_mean, running_var,
               *, stride=1, padding=1, eps=1e-5):
    y = jax.lax.conv_general_dilated(
        x_nchw.astype(jnp.float32), weight_oihw.astype(jnp.float32),
        window_strides=(stride, stride),
        padding=[(padding, padding), (padding, padding)],
        dimension_numbers=("NCHW", "OIHW", "NCHW"))
    scale = (gamma / jnp.sqrt(running_var + eps)).reshape(1, -1, 1, 1)
    shift = (beta - running_mean * gamma / jnp.sqrt(running_var + eps)).reshape(1, -1, 1, 1)
    return jnp.maximum(y * scale + shift, 0.0)


if __name__ == "__main__":
    # Small shapes consistent with ConvBNReLU(in_chan=4, out_chan=8, ks=3, stride=1, padding=1)
    N, CIN, COUT, H, W = 2, 4, 8, 16, 16
    KS = 3

    key = jax.random.PRNGKey(0)
    kx, kw = jax.random.split(key)

    x = jax.random.normal(kx, (N, CIN, H, W), dtype=jnp.float32)

    # kaiming_normal_(a=1): gain = sqrt(2/(1+a^2)) = 1, std = 1/sqrt(fan_in)
    fan_in = CIN * KS * KS
    conv_weight = jax.random.normal(kw, (COUT, CIN, KS, KS), dtype=jnp.float32) / jnp.sqrt(
        jnp.float32(fan_in))

    # BatchNorm2d default-initialized parameters / running stats
    gamma = jnp.ones((COUT,), jnp.float32)
    beta = jnp.zeros((COUT,), jnp.float32)
    running_mean = jnp.zeros((COUT,), jnp.float32)
    running_var = jnp.ones((COUT,), jnp.float32)

    ref = _reference(x, conv_weight, gamma, beta, running_mean, running_var)

    # f32 compute path (tight tolerance)
    fwd_f32 = jax.jit(functools.partial(conv_bn_relu, stride=1, padding=1,
                                        compute_dtype=jnp.float32))
    out_f32 = jax.block_until_ready(fwd_f32(x, conv_weight, gamma, beta,
                                            running_mean, running_var))
    np.testing.assert_allclose(np.asarray(out_f32), np.asarray(ref), rtol=1e-4, atol=1e-4)

    # bf16 MXU path (recommended on v6e/v7x); f32 accumulation & epilogue, loose tolerance
    fwd_bf16 = jax.jit(functools.partial(conv_bn_relu, stride=1, padding=1,
                                         compute_dtype=jnp.bfloat16))
    out_bf16 = jax.block_until_ready(fwd_bf16(x, conv_weight, gamma, beta,
                                              running_mean, running_var))
    np.testing.assert_allclose(np.asarray(out_bf16), np.asarray(ref), rtol=1e-1, atol=1e-1)

    print("KERNEL_OK")
</pallas_src>

<mosaic_0001>
module attributes {stable_mosaic.version = 11 : i64} {
  func.func @_conv_bn_relu_kernel(%arg0: i32, %arg1: memref<2x36x256xf32, #tpu.memory_space<vmem>>, %arg2: memref<8x36xf32, #tpu.memory_space<vmem>>, %arg3: memref<8x1xf32, #tpu.memory_space<vmem>>, %arg4: memref<2x8x256xf32, #tpu.memory_space<vmem>>) attributes {dimension_semantics = [#tpu.dimension_semantics<arbitrary>], iteration_bounds = array<i64: 1>, scalar_prefetch = 0 : i64, scratch_operands = 0 : i64, tpu.core_type = #tpu.core_type<tc>, window_params = [{pipeline_mode = #tpu.pipeline_mode<synchronous>, transform_indices = @transform_0, window_bounds = array<i64: 2, 36, 256>}, {pipeline_mode = #tpu.pipeline_mode<synchronous>, transform_indices = @transform_1, window_bounds = array<i64: 8, 36>}, {pipeline_mode = #tpu.pipeline_mode<synchronous>, transform_indices = @transform_2, window_bounds = array<i64: 8, 1>}, {pipeline_mode = #tpu.pipeline_mode<synchronous>, transform_indices = @transform_3, window_bounds = array<i64: 2, 8, 256>}]} {
    %c0 = arith.constant 0 : index
    %c0_0 = arith.constant 0 : index
    %0 = vector.load %arg2[%c0, %c0_0] : memref<8x36xf32, #tpu.memory_space<vmem>>, vector<8x36xf32>
    %c0_1 = arith.constant 0 : index
    %c0_2 = arith.constant 0 : index
    %1 = vector.load %arg3[%c0_1, %c0_2] : memref<8x1xf32, #tpu.memory_space<vmem>>, vector<8x1xf32>
    %c0_3 = arith.constant 0 : index
    %c0_4 = arith.constant 0 : index
    %c0_5 = arith.constant 0 : index
    %2 = vector.load %arg1[%c0_3, %c0_4, %c0_5] : memref<2x36x256xf32, #tpu.memory_space<vmem>>, vector<1x36x256xf32>
    %3 = vector.shape_cast %2 : vector<1x36x256xf32> to vector<36x256xf32>
    %cst = arith.constant dense<0.000000e+00> : vector<8x256xf32>
    %4 = tpu.matmul %0, %3, %cst {dimension_numbers = #tpu.dot_dimension_numbers<[1], [0], [0], [1], [0, 0, 1, 1], [], []>} : vector<8x36xf32>, vector<36x256xf32>, vector<8x256xf32> -> vector<8x256xf32>
    %5 = vector.broadcast %1 : vector<8x1xf32> to vector<8x256xf32>
    %6 = arith.addf %4, %5 : vector<8x256xf32>
    %cst_6 = arith.constant 0.000000e+00 : f32
    %7 = vector.broadcast %cst_6 : f32 to vector<8x256xf32>
    %8 = arith.maximumf %6, %7 : vector<8x256xf32>
    %c0_7 = arith.constant 0 : index
    %c0_8 = arith.constant 0 : index
    %c0_9 = arith.constant 0 : index
    %9 = vector.load %arg4[%c0_7, %c0_8, %c0_9] : memref<2x8x256xf32, #tpu.memory_space<vmem>>, vector<1x8x256xf32>
    %10 = vector.shape_cast %9 : vector<1x8x256xf32> to vector<8x256xf32>
    %11 = vector.shape_cast %8 : vector<8x256xf32> to vector<1x8x256xf32>
    tpu.vector_store %arg4[%c0_7, %c0_8, %c0_9], %11 {strides = array<i32>} : memref<2x8x256xf32, #tpu.memory_space<vmem>>, vector<1x8x256xf32>,
    %c1 = arith.constant 1 : index
    %c0_10 = arith.constant 0 : index
    %c0_11 = arith.constant 0 : index
    %12 = vector.load %arg1[%c1, %c0_10, %c0_11] : memref<2x36x256xf32, #tpu.memory_space<vmem>>, vector<1x36x256xf32>
    %13 = vector.shape_cast %12 : vector<1x36x256xf32> to vector<36x256xf32>
    %cst_12 = arith.constant dense<0.000000e+00> : vector<8x256xf32>
    %14 = tpu.matmul %0, %13, %cst_12 {dimension_numbers = #tpu.dot_dimension_numbers<[1], [0], [0], [1], [0, 0, 1, 1], [], []>} : vector<8x36xf32>, vector<36x256xf32>, vector<8x256xf32> -> vector<8x256xf32>
    %15 = vector.broadcast %1 : vector<8x1xf32> to vector<8x256xf32>
    %16 = arith.addf %14, %15 : vector<8x256xf32>
    %cst_13 = arith.constant 0.000000e+00 : f32
    %17 = vector.broadcast %cst_13 : f32 to vector<8x256xf32>
    %18 = arith.maximumf %16, %17 : vector<8x256xf32>
    %c1_14 = arith.constant 1 : index
    %c0_15 = arith.constant 0 : index
    %c0_16 = arith.constant 0 : index
    %19 = vector.load %arg4[%c1_14, %c0_15, %c0_16] : memref<2x8x256xf32, #tpu.memory_space<vmem>>, vector<1x8x256xf32>
    %20 = vector.shape_cast %19 : vector<1x8x256xf32> to vector<8x256xf32>
    %21 = vector.shape_cast %18 : vector<8x256xf32> to vector<1x8x256xf32>
    tpu.vector_store %arg4[%c1_14, %c0_15, %c0_16], %21 {strides = array<i32>} : memref<2x8x256xf32, #tpu.memory_space<vmem>>, vector<1x8x256xf32>,
    return
  }
  func.func @transform_0(%arg0: i32) -> (i32, i32, i32) {
    %c0_i32 = arith.constant 0 : i32
    %c0_i32_0 = arith.constant 0 : i32
    %c0_i32_1 = arith.constant 0 : i32
    %c0_i32_2 = arith.constant 0 : i32
    return %c0_i32, %c0_i32_0, %c0_i32_1 : i32, i32, i32
  }
  func.func @transform_1(%arg0: i32) -> (i32, i32) {
    %c0_i32 = arith.constant 0 : i32
    %c0_i32_0 = arith.constant 0 : i32
    %c0_i32_1 = arith.constant 0 : i32
    return %c0_i32, %c0_i32_0 : i32, i32
  }
  func.func @transform_2(%arg0: i32) -> (i32, i32) {
    %c0_i32 = arith.constant 0 : i32
    %c0_i32_0 = arith.constant 0 : i32
    %c0_i32_1 = arith.constant 0 : i32
    return %c0_i32, %c0_i32_0 : i32, i32
  }
  func.func @transform_3(%arg0: i32) -> (i32, i32, i32) {
    %c0_i32 = arith.constant 0 : i32
    %c0_i32_0 = arith.constant 0 : i32
    %c0_i32_1 = arith.constant 0 : i32
    %c0_i32_2 = arith.constant 0 : i32
    return %c0_i32, %c0_i32_0, %c0_i32_1 : i32, i32, i32
  }
}

</mosaic_0001>

<bundles_post_ra>
// kernel: conv_bn_relu.1
= control target key start
LH: loop header
LB: loop body
LE: loop exit
PB: predicated region body
PF: predicated region fallthrough
CT: control target
= control target key end

     0   :  { %v251_v3 = vmov 0.0   ;;  %v252_v8 = vmov 0   ;;  %vm35_vm0 = vcmask 1043456   ;;  %vm31_vm1 = vcmask 293888   ;;  %s351_s0 = inlined_call_operand.vmem [shape: f32[2,36,256], index: 0, kind: input, shape index: {}]   ;;  %s352_s2 = inlined_call_operand.vmem [shape: f32[8,1], index: 2, kind: input, shape index: {}]   ;;  %s353_s1 = inlined_call_operand.vmem [shape: f32[8,36], index: 1, kind: input, shape index: {}]   ;;  %s354_s3 = inlined_call_operand.vmem [shape: f32[2,8,256], index: 3, kind: output, shape index: {}]  }
   0x1   :  { %v17_v0 = vld [vmem:[%s351_s0 + $0x8] sm:$0xff]  ;;  %v19_v1 = vld [vmem:[%s351_s0 + $0x18] sm:$0xff]  ;;  %106 = vmatprep.mubr.f32.mxu0 %v251_v3  ;;  %198 = vmatprep.mubr.f32.mxu1 %v251_v3  ;;  %v16_v6 = vld [vmem:[%s351_s0] sm:$0xff] }
   0x2   :  { %v218_v2 = vld [vmem:[%s351_s0 + $0x58] sm:$0xff]  ;;  %v232_v4 = vpack.c.bf16 %v19_v1, %v17_v0  ;;  %v220_v5 = vld [vmem:[%s351_s0 + $0x68] sm:$0xff]  ;;  %v18_v7 = vld [vmem:[%s351_s0 + $0x10] sm:$0xff]  ;;  %250 = vset.pattern.permute.xlu0 %v252_v8 }
   0x3   :  { %v240_v9 = vpack.c.bf16 %v220_v5, %v218_v2  ;;  %v234_v10 = vpack.c.bf16 %v18_v7, %v16_v6  ;;  %v217_v11 = vld [vmem:[%s351_s0 + $0x50] sm:$0xff]  ;;  %v219_v12 = vld [vmem:[%s351_s0 + $0x60] sm:$0xff]  ;;  %v21_v13 = vld [vmem:[%s351_s0 + $0x28] sm:$0xff] }
   0x4   :  { %233 = vmatprep.subr.bf16.mxu0 %v232_v4  ;;  %v242_v14 = vpack.c.bf16 %v219_v12, %v217_v11  ;;  %v23_v15 = vld [vmem:[%s351_s0 + $0x38] sm:$0xff]  ;;  %v224_v17 = vld [vmem:[%s351_s0 + $0x88] sm:$0xff]  ;;  %v20_v20 = vld [vmem:[%s351_s0 + $0x20] sm:$0xff] }
   0x5   :  { %v222_v16 = vld [vmem:[%s351_s0 + $0x78] sm:$0xff]  ;;  %241 = vmatprep.subr.bf16.mxu1 %v240_v9  ;;  %235 = vmatpush1.bf16.msra.mxu0 %v234_v10  ;;  %v236_v18 = vpack.c.bf16 %v23_v15, %v21_v13  ;;  %v22_v21 = vld [vmem:[%s351_s0 + $0x30] sm:$0xff]  ;;  %v223_v24 = vld [vmem:[%s351_s0 + $0x80] sm:$0xff] }
   0x6   :  { %v244_v19 = vpack.c.bf16 %v224_v17, %v222_v16  ;;  %v221_v22 = vld [vmem:[%s351_s0 + $0x70] sm:$0xff]  ;;  %243 = vmatpush1.bf16.msra.mxu1 %v242_v14  ;;  %v238_v23 = vpack.c.bf16 %v22_v21, %v20_v20  ;;  %v25_v26 = vld [vmem:[%s351_s0 + $0x48] sm:$0xf]  ;;  %v226_v27 = vld [vmem:[%s351_s0 + $0x98] sm:$0xf] }
   0x7   :  { %237 = vmatprep.subr.bf16.mxu0 %v236_v18  ;;  %v246_v25 = vpack.c.bf16 %v223_v24, %v221_v22  ;;  %v15_v28 = vld [vmem:[%s352_s2] sm:$0xff]  ;;  %v225_v30 = vld [vmem:[%s351_s0 + $0x90] sm:$0xf] }
   0x8   :  { %245 = vmatprep.subr.bf16.mxu1 %v244_v19  ;;  %28 = vperm.xlu0 %250, %v15_v28   ;;  %v24_v29 = vld [vmem:[%s351_s0 + $0x40] sm:$0xf] }
   0x9   :  { %239 = vmatpush1.bf16.msra.mxu0 %v238_v23  ;;  %v14_v31 = vld [vmem:[%s353_s1] sm:$0xff] }
   0xa   :  { %247 = vmatpush1.bf16.msra.mxu1 %v246_v25  ;;  %214 = vmatprep.subr.msk.mxu0 %vm35_vm0, %v25_v26 }
   0xb   :  { %227 = vmatprep.subr.msk.mxu1 %vm35_vm0, %v226_v27 }
   0xd   :  { %215 = vmatpush1.msk.msra.mxu0 %vm35_vm0, %v24_v29 }
   0xe   :  { %228 = vmatpush1.msk.msra.mxu1 %vm35_vm0, %v225_v30  ;;  %216 = vmatmul.mubr.msk.f32.vlgmr.msra.gmra.mrb[0].mxu0 %vm31_vm1, %v14_v31 }
   0xf   :  { %229 = vmatmul.mubr.msk.f32.vlgmr.msra.gmra.mrb[0].mxu1 %vm31_vm1, %v14_v31 }
  0x87   :  { %v29_v32 = vpop.permute.xlu0 %28 }
  0xe1   :  { %v108_v33 = vpop.f32.mrb[0].mxu0 }
  0xe2   :  { %v109_v34 = vadd.f32 %v108_v33, %v29_v32  ;;  %v200_v35 = vpop.f32.mrb[0].mxu1  ;;  %v110_v36 = vpop.f32.mrb[1].mxu0 }
  0xe3   :  { %v201_v37 = vadd.f32 %v200_v35, %v29_v32  ;;  %v111_v38 = vadd.f32 %v110_v36, %v29_v32  ;;  %v202_v39 = vpop.f32.mrb[1].mxu1 }
  0xe4   :  { %v113_v40 = vmax.f32 %v109_v34, 0.0  ;;  %v203_v41 = vadd.f32 %v202_v39, %v29_v32 }
  0xe5   :  { %v205_v42 = vmax.f32 %v201_v37, 0.0  ;;  %v114_v43 = vmax.f32 %v111_v38, 0.0 }
  0xe6   :  { %115 = vst [vmem:[%s354_s3] sm:$0xff] %v113_v40  ;;  %v206_v44 = vmax.f32 %v203_v41, 0.0 }
  0xe7   :  { %230 = vst [vmem:[%s354_s3 + $0x10] sm:$0xff] %v205_v42  ;;  %116 = vst [vmem:[%s354_s3 + $0x8] sm:$0xff] %v114_v43 }
  0xe8   :  { %231 = vst [vmem:[%s354_s3 + $0x18] sm:$0xff] %v206_v44 }

</bundles_post_ra>
